<compile_context>
chip_gen: v7x
topology: tpu7x:2x2x1
jax: 0.10.0
libtpu: 0.0.40
codegen_flags: <defaults>
</compile_context>

<pallas_src>
import math

import jax
import jax.numpy as jnp
import numpy as np
from jax.experimental import pallas as pl
from jax.experimental.pallas import tpu as pltpu

_CHUNK = 128  # lane width of one output column chunk


def _round_up(x: int, m: int) -> int:
    return ((x + m - 1) // m) * m


def _make_s4d_tile_kernel(n2: int, n_chunks: int):
    """Kernel producing one (TH, TL) tile of K[h, l] = Re(sum_n w_n * z_n^l).

    Inputs (all f32, complex numbers split into re/im planes):
      wo_* : (1, TH, N2)     w_n * z_n^(j*TL)     per-(H,L)-tile weighted offset
      s_*  : (TH, N2)        z_n^128              chunk-advance factor
      pb_* : (N2, TH, 128)   z_n^t, t in [0,128)  base powers (shared by all L tiles)
    """

    def kernel(wo_re_ref, wo_im_ref, s_re_ref, s_im_ref,
               pb_re_ref, pb_im_ref, k_ref):
        th = k_ref.shape[0]

        wos_re = wo_re_ref[0]                       # (TH, N2) running w * z^(j*TL + c*128)
        wos_im = wo_im_ref[0]
        if n_chunks > 1:
            s_re = s_re_ref[...]                    # (TH, N2), loaded once per tile
            s_im = s_im_ref[...]

        for c in range(n_chunks):                   # static: every store is lane-aligned
            acc = jnp.zeros((th, _CHUNK), jnp.float32)
            for n in range(n2):                     # small static state dim, fully unrolled
                # Explicit lane-splat of the per-state weight (real part only is needed).
                wr = jnp.broadcast_to(wos_re[:, n:n + 1], (th, _CHUNK))
                wi = jnp.broadcast_to(wos_im[:, n:n + 1], (th, _CHUNK))
                acc = acc + (wr * pb_re_ref[n] - wi * pb_im_ref[n])
            k_ref[:, c * _CHUNK:(c + 1) * _CHUNK] = acc     # unmasked 128-lane store

            if c + 1 < n_chunks:                    # advance wos by z^128: tiny (TH,N2) complex mul
                wos_re, wos_im = (wos_re * s_re - wos_im * s_im,
                                  wos_re * s_im + wos_im * s_re)

    return kernel


def s4d_forward(log_dt, C_real, log_A_real, A_imag, length, *, th=None, tl=None):
    """S4DKernel.forward.  C_real is the view_as_real parameter (H, N//2, 2); returns K (H, length)."""
    H, N2, _ = C_real.shape

    # ---- tile sizes -------------------------------------------------------------------
    if th is None:
        th = min(64, _round_up(H, 8))
    th = _round_up(th, 8)
    Hpad = _round_up(H, th)

    Lr = _round_up(length, _CHUNK)
    if tl is None:
        tl = min(1024, Lr)
        # v7x megacore: prefer >= 2 total grid points so both TensorCores get work.
        if Hpad // th == 1 and tl == Lr and Lr >= 2 * _CHUNK:
            tl = _round_up(Lr // 2, _CHUNK)
    tl = _round_up(tl, _CHUNK)
    Lpad = _round_up(length, tl)
    n_chunks = tl // _CHUNK
    Lgrid = Lpad // tl

    # ---- prologue (plain JAX): all transcendentals / tiny per-(H,N2) work --------------
    f32 = jnp.float32
    dt = jnp.exp(log_dt.astype(f32)).reshape(H, 1)                       # (H, 1)
    C = (C_real[..., 0] + 1j * C_real[..., 1]).astype(jnp.complex64)     # (H, N2)
    A = (-jnp.exp(log_A_real.astype(f32))
         + 1j * A_imag.astype(f32)).astype(jnp.complex64)                # (H, N2)
    dtA = A * dt
    z = jnp.exp(dtA)                                                     # z = exp(dt*A)
    w = 2.0 * C * (z - 1.0) / A        # K[h,l] = Re(sum_n w z^l)  (matches torch formulation)
    # TODO(synk): optionally use a complex expm1 composition for (z-1) for tighter accuracy.

    # Base powers z^t, t in [0, 128): shared by every L tile / chunk.
    t = jnp.arange(_CHUNK, dtype=f32)
    pows = jnp.exp(dtA[:, :, None] * t)                                  # (H, N2, 128)

    # z^128 (chunk-advance factor) by repeated squaring (no large-argument trig).
    z128 = z
    for _ in range(7):
        z128 = z128 * z128

    # z^tl by binary exponentiation, then per-L-tile weighted offsets w * z^(j*tl).
    ztl = jnp.ones_like(z128)
    base = z128
    m = n_chunks
    while m:
        if m & 1:
            ztl = ztl * base
        base = base * base
        m >>= 1
    offs = [jnp.ones_like(z)]
    for _ in range(Lgrid - 1):
        offs.append(offs[-1] * ztl)
    wo = w[None, :, :] * jnp.stack(offs, axis=0)                         # (Lgrid, H, N2)

    def split_pad(x, h_axis):
        re = jnp.real(x).astype(f32)
        im = jnp.imag(x).astype(f32)
        if Hpad != H:
            pad = [(0, 0)] * re.ndim
            pad[h_axis] = (0, Hpad - H)
            re = jnp.pad(re, pad)          # zero-padded rows produce exactly 0 (no NaNs)
            im = jnp.pad(im, pad)
        return re, im

    wo_re, wo_im = split_pad(wo, 1)                                      # (Lgrid, Hpad, N2)
    s_re, s_im = split_pad(z128, 0)                                      # (Hpad, N2)
    pb_re, pb_im = split_pad(jnp.transpose(pows, (1, 0, 2)), 1)          # (N2, Hpad, 128)

    kernel = _make_s4d_tile_kernel(N2, n_chunks)

    wo_spec = pl.BlockSpec((1, th, N2), lambda i, j: (j, i, 0))   # tiny DMA, changes every step
    s_spec = pl.BlockSpec((th, N2), lambda i, j: (i, 0))          # H-tile only: no re-DMA across j
    pb_spec = pl.BlockSpec((N2, th, _CHUNK), lambda i, j: (0, i, 0))
    out_spec = pl.BlockSpec((th, tl), lambda i, j: (i, j))        # lane-dense output tile

    k_pad = pl.pallas_call(
        kernel,
        out_shape=jax.ShapeDtypeStruct((Hpad, Lpad), f32),
        grid=(Hpad // th, Lpad // tl),
        in_specs=[wo_spec, wo_spec, s_spec, s_spec, pb_spec, pb_spec],
        out_specs=out_spec,
        compiler_params=pltpu.CompilerParams(
            dimension_semantics=("parallel", "parallel"),   # megacore sharding on v7x
            vmem_limit_bytes=32 * 1024 * 1024,              # explicit, with headroom on all gens
        ),
    )(wo_re, wo_im, s_re, s_im, pb_re, pb_im)

    return k_pad[:H, :length]


if __name__ == "__main__":
    # Small shapes consistent with the module: d_model=H=12, length=L=384, N=16 (N//2 = 8 states).
    # th=8, tl=256 exercises both grid axes (grid = (2, 2)), H padding (12 -> 16),
    # L padding (384 -> 512), per-tile offsets, and the per-chunk z^128 advance (2 chunks/tile).
    H, L, N = 12, 384, 16
    N2 = N // 2
    dt_min, dt_max = 0.001, 0.1

    key = jax.random.PRNGKey(0)
    k1, k2 = jax.random.split(key, 2)

    # Deterministic parameter init mirroring S4DKernel.__init__
    log_dt = (jax.random.uniform(k1, (H,), dtype=jnp.float32)
              * (math.log(dt_max) - math.log(dt_min)) + math.log(dt_min))
    # torch.randn(..., dtype=cfloat): real & imag parts each N(0, 1/2)
    C_real = jax.random.normal(k2, (H, N2, 2), dtype=jnp.float32) * (1.0 / math.sqrt(2.0))
    log_A_real = jnp.log(0.5 * jnp.ones((H, N2), dtype=jnp.float32))
    A_imag = math.pi * jnp.broadcast_to(jnp.arange(N2, dtype=jnp.float32), (H, N2))

    K = s4d_forward(log_dt, C_real, log_A_real, A_imag, L, th=8, tl=256)
    K = jax.block_until_ready(K)

    # Pure-JAX complex reference mirroring the PyTorch forward, for verification.
    dt = jnp.exp(log_dt)
    Cc = C_real[..., 0] + 1j * C_real[..., 1]
    A = -jnp.exp(log_A_real) + 1j * A_imag
    dtA = A * dt[:, None]
    Kc = dtA[:, :, None] * jnp.arange(L)
    Cc = Cc * (jnp.exp(dtA) - 1.0) / A
    K_ref = 2.0 * jnp.einsum("hn,hnl->hl", Cc, jnp.exp(Kc)).real

    assert K.shape == (H, L)
    assert np.allclose(np.asarray(K), np.asarray(K_ref), rtol=1e-3, atol=1e-3)
    print("KERNEL_OK")
</pallas_src>

<mosaic_0001>
module attributes {stable_mosaic.version = 11 : i64} {
  func.func @kernel(%arg0: i32, %arg1: i32, %arg2: memref<1x8x8xf32, #tpu.memory_space<vmem>>, %arg3: memref<1x8x8xf32, #tpu.memory_space<vmem>>, %arg4: memref<8x8xf32, #tpu.memory_space<vmem>>, %arg5: memref<8x8xf32, #tpu.memory_space<vmem>>, %arg6: memref<8x8x128xf32, #tpu.memory_space<vmem>>, %arg7: memref<8x8x128xf32, #tpu.memory_space<vmem>>, %arg8: memref<8x256xf32, #tpu.memory_space<vmem>>) attributes {dimension_semantics = [#tpu.dimension_semantics<parallel>, #tpu.dimension_semantics<parallel>], iteration_bounds = array<i64: 2, 2>, scalar_prefetch = 0 : i64, scratch_operands = 0 : i64, tpu.core_type = #tpu.core_type<tc>, window_params = [{transform_indices = @transform_0, window_bounds = array<i64: 1, 8, 8>}, {transform_indices = @transform_1, window_bounds = array<i64: 1, 8, 8>}, {transform_indices = @transform_2, window_bounds = array<i64: 8, 8>}, {transform_indices = @transform_3, window_bounds = array<i64: 8, 8>}, {transform_indices = @transform_4, window_bounds = array<i64: 8, 8, 128>}, {transform_indices = @transform_5, window_bounds = array<i64: 8, 8, 128>}, {transform_indices = @transform_6, window_bounds = array<i64: 8, 256>}]} {
    %c0 = arith.constant 0 : index
    %c0_0 = arith.constant 0 : index
    %c0_1 = arith.constant 0 : index
    %0 = vector.load %arg2[%c0, %c0_0, %c0_1] : memref<1x8x8xf32, #tpu.memory_space<vmem>>, vector<1x8x8xf32>
    %1 = vector.shape_cast %0 : vector<1x8x8xf32> to vector<8x8xf32>
    %c0_2 = arith.constant 0 : index
    %c0_3 = arith.constant 0 : index
    %c0_4 = arith.constant 0 : index
    %2 = vector.load %arg3[%c0_2, %c0_3, %c0_4] : memref<1x8x8xf32, #tpu.memory_space<vmem>>, vector<1x8x8xf32>
    %3 = vector.shape_cast %2 : vector<1x8x8xf32> to vector<8x8xf32>
    %c0_5 = arith.constant 0 : index
    %c0_6 = arith.constant 0 : index
    %4 = vector.load %arg4[%c0_5, %c0_6] : memref<8x8xf32, #tpu.memory_space<vmem>>, vector<8x8xf32>
    %c0_7 = arith.constant 0 : index
    %c0_8 = arith.constant 0 : index
    %5 = vector.load %arg5[%c0_7, %c0_8] : memref<8x8xf32, #tpu.memory_space<vmem>>, vector<8x8xf32>
    %cst = arith.constant 0.000000e+00 : f32
    %6 = vector.broadcast %cst : f32 to vector<8x128xf32>
    %7 = vector.extract_strided_slice %1 {offsets = [0, 0], sizes = [8, 1], strides = [1, 1]} : vector<8x8xf32> to vector<8x1xf32>
    %8 = vector.shape_cast %7 : vector<8x1xf32> to vector<8x1xf32>
    %9 = vector.broadcast %8 : vector<8x1xf32> to vector<8x128xf32>
    %10 = vector.extract_strided_slice %3 {offsets = [0, 0], sizes = [8, 1], strides = [1, 1]} : vector<8x8xf32> to vector<8x1xf32>
    %11 = vector.shape_cast %10 : vector<8x1xf32> to vector<8x1xf32>
    %12 = vector.broadcast %11 : vector<8x1xf32> to vector<8x128xf32>
    %c0_9 = arith.constant 0 : index
    %c0_10 = arith.constant 0 : index
    %c0_11 = arith.constant 0 : index
    %13 = vector.load %arg6[%c0_9, %c0_10, %c0_11] : memref<8x8x128xf32, #tpu.memory_space<vmem>>, vector<1x8x128xf32>
    %14 = vector.shape_cast %13 : vector<1x8x128xf32> to vector<8x128xf32>
    %15 = arith.mulf %9, %14 : vector<8x128xf32>
    %c0_12 = arith.constant 0 : index
    %c0_13 = arith.constant 0 : index
    %c0_14 = arith.constant 0 : index
    %16 = vector.load %arg7[%c0_12, %c0_13, %c0_14] : memref<8x8x128xf32, #tpu.memory_space<vmem>>, vector<1x8x128xf32>
    %17 = vector.shape_cast %16 : vector<1x8x128xf32> to vector<8x128xf32>
    %18 = arith.mulf %12, %17 : vector<8x128xf32>
    %19 = arith.subf %15, %18 : vector<8x128xf32>
    %20 = arith.addf %6, %19 : vector<8x128xf32>
    %21 = vector.extract_strided_slice %1 {offsets = [0, 1], sizes = [8, 1], strides = [1, 1]} : vector<8x8xf32> to vector<8x1xf32>
    %22 = vector.shape_cast %21 : vector<8x1xf32> to vector<8x1xf32>
    %23 = vector.broadcast %22 : vector<8x1xf32> to vector<8x128xf32>
    %24 = vector.extract_strided_slice %3 {offsets = [0, 1], sizes = [8, 1], strides = [1, 1]} : vector<8x8xf32> to vector<8x1xf32>
    %25 = vector.shape_cast %24 : vector<8x1xf32> to vector<8x1xf32>
    %26 = vector.broadcast %25 : vector<8x1xf32> to vector<8x128xf32>
    %c1 = arith.constant 1 : index
    %c0_15 = arith.constant 0 : index
    %c0_16 = arith.constant 0 : index
    %27 = vector.load %arg6[%c1, %c0_15, %c0_16] : memref<8x8x128xf32, #tpu.memory_space<vmem>>, vector<1x8x128xf32>
    %28 = vector.shape_cast %27 : vector<1x8x128xf32> to vector<8x128xf32>
    %29 = arith.mulf %23, %28 : vector<8x128xf32>
    %c1_17 = arith.constant 1 : index
    %c0_18 = arith.constant 0 : index
    %c0_19 = arith.constant 0 : index
    %30 = vector.load %arg7[%c1_17, %c0_18, %c0_19] : memref<8x8x128xf32, #tpu.memory_space<vmem>>, vector<1x8x128xf32>
    %31 = vector.shape_cast %30 : vector<1x8x128xf32> to vector<8x128xf32>
    %32 = arith.mulf %26, %31 : vector<8x128xf32>
    %33 = arith.subf %29, %32 : vector<8x128xf32>
    %34 = arith.addf %20, %33 : vector<8x128xf32>
    %35 = vector.extract_strided_slice %1 {offsets = [0, 2], sizes = [8, 1], strides = [1, 1]} : vector<8x8xf32> to vector<8x1xf32>
    %36 = vector.shape_cast %35 : vector<8x1xf32> to vector<8x1xf32>
    %37 = vector.broadcast %36 : vector<8x1xf32> to vector<8x128xf32>
    %38 = vector.extract_strided_slice %3 {offsets = [0, 2], sizes = [8, 1], strides = [1, 1]} : vector<8x8xf32> to vector<8x1xf32>
    %39 = vector.shape_cast %38 : vector<8x1xf32> to vector<8x1xf32>
    %40 = vector.broadcast %39 : vector<8x1xf32> to vector<8x128xf32>
    %c2 = arith.constant 2 : index
    %c0_20 = arith.constant 0 : index
    %c0_21 = arith.constant 0 : index
    %41 = vector.load %arg6[%c2, %c0_20, %c0_21] : memref<8x8x128xf32, #tpu.memory_space<vmem>>, vector<1x8x128xf32>
    %42 = vector.shape_cast %41 : vector<1x8x128xf32> to vector<8x128xf32>
    %43 = arith.mulf %37, %42 : vector<8x128xf32>
    %c2_22 = arith.constant 2 : index
    %c0_23 = arith.constant 0 : index
    %c0_24 = arith.constant 0 : index
    %44 = vector.load %arg7[%c2_22, %c0_23, %c0_24] : memref<8x8x128xf32, #tpu.memory_space<vmem>>, vector<1x8x128xf32>
    %45 = vector.shape_cast %44 : vector<1x8x128xf32> to vector<8x128xf32>
    %46 = arith.mulf %40, %45 : vector<8x128xf32>
    %47 = arith.subf %43, %46 : vector<8x128xf32>
    %48 = arith.addf %34, %47 : vector<8x128xf32>
    %49 = vector.extract_strided_slice %1 {offsets = [0, 3], sizes = [8, 1], strides = [1, 1]} : vector<8x8xf32> to vector<8x1xf32>
    %50 = vector.shape_cast %49 : vector<8x1xf32> to vector<8x1xf32>
    %51 = vector.broadcast %50 : vector<8x1xf32> to vector<8x128xf32>
    %52 = vector.extract_strided_slice %3 {offsets = [0, 3], sizes = [8, 1], strides = [1, 1]} : vector<8x8xf32> to vector<8x1xf32>
    %53 = vector.shape_cast %52 : vector<8x1xf32> to vector<8x1xf32>
    %54 = vector.broadcast %53 : vector<8x1xf32> to vector<8x128xf32>
    %c3 = arith.constant 3 : index
    %c0_25 = arith.constant 0 : index
    %c0_26 = arith.constant 0 : index
    %55 = vector.load %arg6[%c3, %c0_25, %c0_26] : memref<8x8x128xf32, #tpu.memory_space<vmem>>, vector<1x8x128xf32>
    %56 = vector.shape_cast %55 : vector<1x8x128xf32> to vector<8x128xf32>
    %57 = arith.mulf %51, %56 : vector<8x128xf32>
    %c3_27 = arith.constant 3 : index
    %c0_28 = arith.constant 0 : index
    %c0_29 = arith.constant 0 : index
    %58 = vector.load %arg7[%c3_27, %c0_28, %c0_29] : memref<8x8x128xf32, #tpu.memory_space<vmem>>, vector<1x8x128xf32>
    %59 = vector.shape_cast %58 : vector<1x8x128xf32> to vector<8x128xf32>
    %60 = arith.mulf %54, %59 : vector<8x128xf32>
    %61 = arith.subf %57, %60 : vector<8x128xf32>
    %62 = arith.addf %48, %61 : vector<8x128xf32>
    %63 = vector.extract_strided_slice %1 {offsets = [0, 4], sizes = [8, 1], strides = [1, 1]} : vector<8x8xf32> to vector<8x1xf32>
    %64 = vector.shape_cast %63 : vector<8x1xf32> to vector<8x1xf32>
    %65 = vector.broadcast %64 : vector<8x1xf32> to vector<8x128xf32>
    %66 = vector.extract_strided_slice %3 {offsets = [0, 4], sizes = [8, 1], strides = [1, 1]} : vector<8x8xf32> to vector<8x1xf32>
    %67 = vector.shape_cast %66 : vector<8x1xf32> to vector<8x1xf32>
    %68 = vector.broadcast %67 : vector<8x1xf32> to vector<8x128xf32>
    %c4 = arith.constant 4 : index
    %c0_30 = arith.constant 0 : index
    %c0_31 = arith.constant 0 : index
    %69 = vector.load %arg6[%c4, %c0_30, %c0_31] : memref<8x8x128xf32, #tpu.memory_space<vmem>>, vector<1x8x128xf32>
    %70 = vector.shape_cast %69 : vector<1x8x128xf32> to vector<8x128xf32>
    %71 = arith.mulf %65, %70 : vector<8x128xf32>
    %c4_32 = arith.constant 4 : index
    %c0_33 = arith.constant 0 : index
    %c0_34 = arith.constant 0 : index
    %72 = vector.load %arg7[%c4_32, %c0_33, %c0_34] : memref<8x8x128xf32, #tpu.memory_space<vmem>>, vector<1x8x128xf32>
    %73 = vector.shape_cast %72 : vector<1x8x128xf32> to vector<8x128xf32>
    %74 = arith.mulf %68, %73 : vector<8x128xf32>
    %75 = arith.subf %71, %74 : vector<8x128xf32>
    %76 = arith.addf %62, %75 : vector<8x128xf32>
    %77 = vector.extract_strided_slice %1 {offsets = [0, 5], sizes = [8, 1], strides = [1, 1]} : vector<8x8xf32> to vector<8x1xf32>
    %78 = vector.shape_cast %77 : vector<8x1xf32> to vector<8x1xf32>
    %79 = vector.broadcast %78 : vector<8x1xf32> to vector<8x128xf32>
    %80 = vector.extract_strided_slice %3 {offsets = [0, 5], sizes = [8, 1], strides = [1, 1]} : vector<8x8xf32> to vector<8x1xf32>
    %81 = vector.shape_cast %80 : vector<8x1xf32> to vector<8x1xf32>
    %82 = vector.broadcast %81 : vector<8x1xf32> to vector<8x128xf32>
    %c5 = arith.constant 5 : index
    %c0_35 = arith.constant 0 : index
    %c0_36 = arith.constant 0 : index
    %83 = vector.load %arg6[%c5, %c0_35, %c0_36] : memref<8x8x128xf32, #tpu.memory_space<vmem>>, vector<1x8x128xf32>
    %84 = vector.shape_cast %83 : vector<1x8x128xf32> to vector<8x128xf32>
    %85 = arith.mulf %79, %84 : vector<8x128xf32>
    %c5_37 = arith.constant 5 : index
    %c0_38 = arith.constant 0 : index
    %c0_39 = arith.constant 0 : index
    %86 = vector.load %arg7[%c5_37, %c0_38, %c0_39] : memref<8x8x128xf32, #tpu.memory_space<vmem>>, vector<1x8x128xf32>
    %87 = vector.shape_cast %86 : vector<1x8x128xf32> to vector<8x128xf32>
    %88 = arith.mulf %82, %87 : vector<8x128xf32>
    %89 = arith.subf %85, %88 : vector<8x128xf32>
    %90 = arith.addf %76, %89 : vector<8x128xf32>
    %91 = vector.extract_strided_slice %1 {offsets = [0, 6], sizes = [8, 1], strides = [1, 1]} : vector<8x8xf32> to vector<8x1xf32>
    %92 = vector.shape_cast %91 : vector<8x1xf32> to vector<8x1xf32>
    %93 = vector.broadcast %92 : vector<8x1xf32> to vector<8x128xf32>
    %94 = vector.extract_strided_slice %3 {offsets = [0, 6], sizes = [8, 1], strides = [1, 1]} : vector<8x8xf32> to vector<8x1xf32>
    %95 = vector.shape_cast %94 : vector<8x1xf32> to vector<8x1xf32>
    %96 = vector.broadcast %95 : vector<8x1xf32> to vector<8x128xf32>
    %c6 = arith.constant 6 : index
    %c0_40 = arith.constant 0 : index
    %c0_41 = arith.constant 0 : index
    %97 = vector.load %arg6[%c6, %c0_40, %c0_41] : memref<8x8x128xf32, #tpu.memory_space<vmem>>, vector<1x8x128xf32>
    %98 = vector.shape_cast %97 : vector<1x8x128xf32> to vector<8x128xf32>
    %99 = arith.mulf %93, %98 : vector<8x128xf32>
    %c6_42 = arith.constant 6 : index
    %c0_43 = arith.constant 0 : index
    %c0_44 = arith.constant 0 : index
    %100 = vector.load %arg7[%c6_42, %c0_43, %c0_44] : memref<8x8x128xf32, #tpu.memory_space<vmem>>, vector<1x8x128xf32>
    %101 = vector.shape_cast %100 : vector<1x8x128xf32> to vector<8x128xf32>
    %102 = arith.mulf %96, %101 : vector<8x128xf32>
    %103 = arith.subf %99, %102 : vector<8x128xf32>
    %104 = arith.addf %90, %103 : vector<8x128xf32>
    %105 = vector.extract_strided_slice %1 {offsets = [0, 7], sizes = [8, 1], strides = [1, 1]} : vector<8x8xf32> to vector<8x1xf32>
    %106 = vector.shape_cast %105 : vector<8x1xf32> to vector<8x1xf32>
    %107 = vector.broadcast %106 : vector<8x1xf32> to vector<8x128xf32>
    %108 = vector.extract_strided_slice %3 {offsets = [0, 7], sizes = [8, 1], strides = [1, 1]} : vector<8x8xf32> to vector<8x1xf32>
    %109 = vector.shape_cast %108 : vector<8x1xf32> to vector<8x1xf32>
    %110 = vector.broadcast %109 : vector<8x1xf32> to vector<8x128xf32>
    %c7 = arith.constant 7 : index
    %c0_45 = arith.constant 0 : index
    %c0_46 = arith.constant 0 : index
    %111 = vector.load %arg6[%c7, %c0_45, %c0_46] : memref<8x8x128xf32, #tpu.memory_space<vmem>>, vector<1x8x128xf32>
    %112 = vector.shape_cast %111 : vector<1x8x128xf32> to vector<8x128xf32>
    %113 = arith.mulf %107, %112 : vector<8x128xf32>
    %c7_47 = arith.constant 7 : index
    %c0_48 = arith.constant 0 : index
    %c0_49 = arith.constant 0 : index
    %114 = vector.load %arg7[%c7_47, %c0_48, %c0_49] : memref<8x8x128xf32, #tpu.memory_space<vmem>>, vector<1x8x128xf32>
    %115 = vector.shape_cast %114 : vector<1x8x128xf32> to vector<8x128xf32>
    %116 = arith.mulf %110, %115 : vector<8x128xf32>
    %117 = arith.subf %113, %116 : vector<8x128xf32>
    %118 = arith.addf %104, %117 : vector<8x128xf32>
    %c0_50 = arith.constant 0 : index
    %c0_51 = arith.constant 0 : index
    %119 = vector.load %arg8[%c0_50, %c0_51] : memref<8x256xf32, #tpu.memory_space<vmem>>, vector<8x128xf32>
    tpu.vector_store %arg8[%c0_50, %c0_51], %118 {strides = array<i32>} : memref<8x256xf32, #tpu.memory_space<vmem>>, vector<8x128xf32>,
    %120 = arith.mulf %1, %4 : vector<8x8xf32>
    %121 = arith.mulf %3, %5 : vector<8x8xf32>
    %122 = arith.subf %120, %121 : vector<8x8xf32>
    %123 = arith.mulf %1, %5 : vector<8x8xf32>
    %124 = arith.mulf %3, %4 : vector<8x8xf32>
    %125 = arith.addf %123, %124 : vector<8x8xf32>
    %cst_52 = arith.constant 0.000000e+00 : f32
    %126 = vector.broadcast %cst_52 : f32 to vector<8x128xf32>
    %127 = vector.extract_strided_slice %122 {offsets = [0, 0], sizes = [8, 1], strides = [1, 1]} : vector<8x8xf32> to vector<8x1xf32>
    %128 = vector.shape_cast %127 : vector<8x1xf32> to vector<8x1xf32>
    %129 = vector.broadcast %128 : vector<8x1xf32> to vector<8x128xf32>
    %130 = vector.extract_strided_slice %125 {offsets = [0, 0], sizes = [8, 1], strides = [1, 1]} : vector<8x8xf32> to vector<8x1xf32>
    %131 = vector.shape_cast %130 : vector<8x1xf32> to vector<8x1xf32>
    %132 = vector.broadcast %131 : vector<8x1xf32> to vector<8x128xf32>
    %c0_53 = arith.constant 0 : index
    %c0_54 = arith.constant 0 : index
    %c0_55 = arith.constant 0 : index
    %133 = vector.load %arg6[%c0_53, %c0_54, %c0_55] : memref<8x8x128xf32, #tpu.memory_space<vmem>>, vector<1x8x128xf32>
    %134 = vector.shape_cast %133 : vector<1x8x128xf32> to vector<8x128xf32>
    %135 = arith.mulf %129, %134 : vector<8x128xf32>
    %c0_56 = arith.constant 0 : index
    %c0_57 = arith.constant 0 : index
    %c0_58 = arith.constant 0 : index
    %136 = vector.load %arg7[%c0_56, %c0_57, %c0_58] : memref<8x8x128xf32, #tpu.memory_space<vmem>>, vector<1x8x128xf32>
    %137 = vector.shape_cast %136 : vector<1x8x128xf32> to vector<8x128xf32>
    %138 = arith.mulf %132, %137 : vector<8x128xf32>
    %139 = arith.subf %135, %138 : vector<8x128xf32>
    %140 = arith.addf %126, %139 : vector<8x128xf32>
    %141 = vector.extract_strided_slice %122 {offsets = [0, 1], sizes = [8, 1], strides = [1, 1]} : vector<8x8xf32> to vector<8x1xf32>
    %142 = vector.shape_cast %141 : vector<8x1xf32> to vector<8x1xf32>
    %143 = vector.broadcast %142 : vector<8x1xf32> to vector<8x128xf32>
    %144 = vector.extract_strided_slice %125 {offsets = [0, 1], sizes = [8, 1], strides = [1, 1]} : vector<8x8xf32> to vector<8x1xf32>
    %145 = vector.shape_cast %144 : vector<8x1xf32> to vector<8x1xf32>
    %146 = vector.broadcast %145 : vector<8x1xf32> to vector<8x128xf32>
    %c1_59 = arith.constant 1 : index
    %c0_60 = arith.constant 0 : index
    %c0_61 = arith.constant 0 : index
    %147 = vector.load %arg6[%c1_59, %c0_60, %c0_61] : memref<8x8x128xf32, #tpu.memory_space<vmem>>, vector<1x8x128xf32>
    %148 = vector.shape_cast %147 : vector<1x8x128xf32> to vector<8x128xf32>
    %149 = arith.mulf %143, %148 : vector<8x128xf32>
    %c1_62 = arith.constant 1 : index
    %c0_63 = arith.constant 0 : index
    %c0_64 = arith.constant 0 : index
    %150 = vector.load %arg7[%c1_62, %c0_63, %c0_64] : memref<8x8x128xf32, #tpu.memory_space<vmem>>, vector<1x8x128xf32>
    %151 = vector.shape_cast %150 : vector<1x8x128xf32> to vector<8x128xf32>
    %152 = arith.mulf %146, %151 : vector<8x128xf32>
    %153 = arith.subf %149, %152 : vector<8x128xf32>
    %154 = arith.addf %140, %153 : vector<8x128xf32>
    %155 = vector.extract_strided_slice %122 {offsets = [0, 2], sizes = [8, 1], strides = [1, 1]} : vector<8x8xf32> to vector<8x1xf32>
    %156 = vector.shape_cast %155 : vector<8x1xf32> to vector<8x1xf32>
    %157 = vector.broadcast %156 : vector<8x1xf32> to vector<8x128xf32>
    %158 = vector.extract_strided_slice %125 {offsets = [0, 2], sizes = [8, 1], strides = [1, 1]} : vector<8x8xf32> to vector<8x1xf32>
    %159 = vector.shape_cast %158 : vector<8x1xf32> to vector<8x1xf32>
    %160 = vector.broadcast %159 : vector<8x1xf32> to vector<8x128xf32>
    %c2_65 = arith.constant 2 : index
    %c0_66 = arith.constant 0 : index
    %c0_67 = arith.constant 0 : index
    %161 = vector.load %arg6[%c2_65, %c0_66, %c0_67] : memref<8x8x128xf32, #tpu.memory_space<vmem>>, vector<1x8x128xf32>
    %162 = vector.shape_cast %161 : vector<1x8x128xf32> to vector<8x128xf32>
    %163 = arith.mulf %157, %162 : vector<8x128xf32>
    %c2_68 = arith.constant 2 : index
    %c0_69 = arith.constant 0 : index
    %c0_70 = arith.constant 0 : index
    %164 = vector.load %arg7[%c2_68, %c0_69, %c0_70] : memref<8x8x128xf32, #tpu.memory_space<vmem>>, vector<1x8x128xf32>
    %165 = vector.shape_cast %164 : vector<1x8x128xf32> to vector<8x128xf32>
    %166 = arith.mulf %160, %165 : vector<8x128xf32>
    %167 = arith.subf %163, %166 : vector<8x128xf32>
    %168 = arith.addf %154, %167 : vector<8x128xf32>
    %169 = vector.extract_strided_slice %122 {offsets = [0, 3], sizes = [8, 1], strides = [1, 1]} : vector<8x8xf32> to vector<8x1xf32>
    %170 = vector.shape_cast %169 : vector<8x1xf32> to vector<8x1xf32>
    %171 = vector.broadcast %170 : vector<8x1xf32> to vector<8x128xf32>
    %172 = vector.extract_strided_slice %125 {offsets = [0, 3], sizes = [8, 1], strides = [1, 1]} : vector<8x8xf32> to vector<8x1xf32>
    %173 = vector.shape_cast %172 : vector<8x1xf32> to vector<8x1xf32>
    %174 = vector.broadcast %173 : vector<8x1xf32> to vector<8x128xf32>
    %c3_71 = arith.constant 3 : index
    %c0_72 = arith.constant 0 : index
    %c0_73 = arith.constant 0 : index
    %175 = vector.load %arg6[%c3_71, %c0_72, %c0_73] : memref<8x8x128xf32, #tpu.memory_space<vmem>>, vector<1x8x128xf32>
    %176 = vector.shape_cast %175 : vector<1x8x128xf32> to vector<8x128xf32>
    %177 = arith.mulf %171, %176 : vector<8x128xf32>
    %c3_74 = arith.constant 3 : index
    %c0_75 = arith.constant 0 : index
    %c0_76 = arith.constant 0 : index
    %178 = vector.load %arg7[%c3_74, %c0_75, %c0_76] : memref<8x8x128xf32, #tpu.memory_space<vmem>>, vector<1x8x128xf32>
    %179 = vector.shape_cast %178 : vector<1x8x128xf32> to vector<8x128xf32>
    %180 = arith.mulf %174, %179 : vector<8x128xf32>
    %181 = arith.subf %177, %180 : vector<8x128xf32>
    %182 = arith.addf %168, %181 : vector<8x128xf32>
    %183 = vector.extract_strided_slice %122 {offsets = [0, 4], sizes = [8, 1], strides = [1, 1]} : vector<8x8xf32> to vector<8x1xf32>
    %184 = vector.shape_cast %183 : vector<8x1xf32> to vector<8x1xf32>
    %185 = vector.broadcast %184 : vector<8x1xf32> to vector<8x128xf32>
    %186 = vector.extract_strided_slice %125 {offsets = [0, 4], sizes = [8, 1], strides = [1, 1]} : vector<8x8xf32> to vector<8x1xf32>
    %187 = vector.shape_cast %186 : vector<8x1xf32> to vector<8x1xf32>
    %188 = vector.broadcast %187 : vector<8x1xf32> to vector<8x128xf32>
    %c4_77 = arith.constant 4 : index
    %c0_78 = arith.constant 0 : index
    %c0_79 = arith.constant 0 : index
    %189 = vector.load %arg6[%c4_77, %c0_78, %c0_79] : memref<8x8x128xf32, #tpu.memory_space<vmem>>, vector<1x8x128xf32>
    %190 = vector.shape_cast %189 : vector<1x8x128xf32> to vector<8x128xf32>
    %191 = arith.mulf %185, %190 : vector<8x128xf32>
    %c4_80 = arith.constant 4 : index
    %c0_81 = arith.constant 0 : index
    %c0_82 = arith.constant 0 : index
    %192 = vector.load %arg7[%c4_80, %c0_81, %c0_82] : memref<8x8x128xf32, #tpu.memory_space<vmem>>, vector<1x8x128xf32>
    %193 = vector.shape_cast %192 : vector<1x8x128xf32> to vector<8x128xf32>
    %194 = arith.mulf %188, %193 : vector<8x128xf32>
    %195 = arith.subf %191, %194 : vector<8x128xf32>
    %196 = arith.addf %182, %195 : vector<8x128xf32>
    %197 = vector.extract_strided_slice %122 {offsets = [0, 5], sizes = [8, 1], strides = [1, 1]} : vector<8x8xf32> to vector<8x1xf32>
    %198 = vector.shape_cast %197 : vector<8x1xf32> to vector<8x1xf32>
    %199 = vector.broadcast %198 : vector<8x1xf32> to vector<8x128xf32>
    %200 = vector.extract_strided_slice %125 {offsets = [0, 5], sizes = [8, 1], strides = [1, 1]} : vector<8x8xf32> to vector<8x1xf32>
    %201 = vector.shape_cast %200 : vector<8x1xf32> to vector<8x1xf32>
    %202 = vector.broadcast %201 : vector<8x1xf32> to vector<8x128xf32>
    %c5_83 = arith.constant 5 : index
    %c0_84 = arith.constant 0 : index
    %c0_85 = arith.constant 0 : index
    %203 = vector.load %arg6[%c5_83, %c0_84, %c0_85] : memref<8x8x128xf32, #tpu.memory_space<vmem>>, vector<1x8x128xf32>
    %204 = vector.shape_cast %203 : vector<1x8x128xf32> to vector<8x128xf32>
    %205 = arith.mulf %199, %204 : vector<8x128xf32>
    %c5_86 = arith.constant 5 : index
    %c0_87 = arith.constant 0 : index
    %c0_88 = arith.constant 0 : index
    %206 = vector.load %arg7[%c5_86, %c0_87, %c0_88] : memref<8x8x128xf32, #tpu.memory_space<vmem>>, vector<1x8x128xf32>
    %207 = vector.shape_cast %206 : vector<1x8x128xf32> to vector<8x128xf32>
    %208 = arith.mulf %202, %207 : vector<8x128xf32>
    %209 = arith.subf %205, %208 : vector<8x128xf32>
    %210 = arith.addf %196, %209 : vector<8x128xf32>
    %211 = vector.extract_strided_slice %122 {offsets = [0, 6], sizes = [8, 1], strides = [1, 1]} : vector<8x8xf32> to vector<8x1xf32>
    %212 = vector.shape_cast %211 : vector<8x1xf32> to vector<8x1xf32>
    %213 = vector.broadcast %212 : vector<8x1xf32> to vector<8x128xf32>
    %214 = vector.extract_strided_slice %125 {offsets = [0, 6], sizes = [8, 1], strides = [1, 1]} : vector<8x8xf32> to vector<8x1xf32>
    %215 = vector.shape_cast %214 : vector<8x1xf32> to vector<8x1xf32>
    %216 = vector.broadcast %215 : vector<8x1xf32> to vector<8x128xf32>
    %c6_89 = arith.constant 6 : index
    %c0_90 = arith.constant 0 : index
    %c0_91 = arith.constant 0 : index
    %217 = vector.load %arg6[%c6_89, %c0_90, %c0_91] : memref<8x8x128xf32, #tpu.memory_space<vmem>>, vector<1x8x128xf32>
    %218 = vector.shape_cast %217 : vector<1x8x128xf32> to vector<8x128xf32>
    %219 = arith.mulf %213, %218 : vector<8x128xf32>
    %c6_92 = arith.constant 6 : index
    %c0_93 = arith.constant 0 : index
    %c0_94 = arith.constant 0 : index
    %220 = vector.load %arg7[%c6_92, %c0_93, %c0_94] : memref<8x8x128xf32, #tpu.memory_space<vmem>>, vector<1x8x128xf32>
    %221 = vector.shape_cast %220 : vector<1x8x128xf32> to vector<8x128xf32>
    %222 = arith.mulf %216, %221 : vector<8x128xf32>
    %223 = arith.subf %219, %222 : vector<8x128xf32>
    %224 = arith.addf %210, %223 : vector<8x128xf32>
    %225 = vector.extract_strided_slice %122 {offsets = [0, 7], sizes = [8, 1], strides = [1, 1]} : vector<8x8xf32> to vector<8x1xf32>
    %226 = vector.shape_cast %225 : vector<8x1xf32> to vector<8x1xf32>
    %227 = vector.broadcast %226 : vector<8x1xf32> to vector<8x128xf32>
    %228 = vector.extract_strided_slice %125 {offsets = [0, 7], sizes = [8, 1], strides = [1, 1]} : vector<8x8xf32> to vector<8x1xf32>
    %229 = vector.shape_cast %228 : vector<8x1xf32> to vector<8x1xf32>
    %230 = vector.broadcast %229 : vector<8x1xf32> to vector<8x128xf32>
    %c7_95 = arith.constant 7 : index
    %c0_96 = arith.constant 0 : index
    %c0_97 = arith.constant 0 : index
    %231 = vector.load %arg6[%c7_95, %c0_96, %c0_97] : memref<8x8x128xf32, #tpu.memory_space<vmem>>, vector<1x8x128xf32>
    %232 = vector.shape_cast %231 : vector<1x8x128xf32> to vector<8x128xf32>
    %233 = arith.mulf %227, %232 : vector<8x128xf32>
    %c7_98 = arith.constant 7 : index
    %c0_99 = arith.constant 0 : index
    %c0_100 = arith.constant 0 : index
    %234 = vector.load %arg7[%c7_98, %c0_99, %c0_100] : memref<8x8x128xf32, #tpu.memory_space<vmem>>, vector<1x8x128xf32>
    %235 = vector.shape_cast %234 : vector<1x8x128xf32> to vector<8x128xf32>
    %236 = arith.mulf %230, %235 : vector<8x128xf32>
    %237 = arith.subf %233, %236 : vector<8x128xf32>
    %238 = arith.addf %224, %237 : vector<8x128xf32>
    %c0_101 = arith.constant 0 : index
    %c128 = arith.constant 128 : index
    %239 = vector.load %arg8[%c0_101, %c128] : memref<8x256xf32, #tpu.memory_space<vmem>>, vector<8x128xf32>
    tpu.vector_store %arg8[%c0_101, %c128], %238 {strides = array<i32>} : memref<8x256xf32, #tpu.memory_space<vmem>>, vector<8x128xf32>,
    return
  }
  func.func @transform_0(%arg0: i32, %arg1: i32) -> (i32, i32, i32) {
    %c0_i32 = arith.constant 0 : i32
    %c0_i32_0 = arith.constant 0 : i32
    return %arg1, %arg0, %c0_i32 : i32, i32, i32
  }
  func.func @transform_1(%arg0: i32, %arg1: i32) -> (i32, i32, i32) {
    %c0_i32 = arith.constant 0 : i32
    %c0_i32_0 = arith.constant 0 : i32
    return %arg1, %arg0, %c0_i32 : i32, i32, i32
  }
  func.func @transform_2(%arg0: i32, %arg1: i32) -> (i32, i32) {
    %c0_i32 = arith.constant 0 : i32
    %c0_i32_0 = arith.constant 0 : i32
    return %arg0, %c0_i32 : i32, i32
  }
  func.func @transform_3(%arg0: i32, %arg1: i32) -> (i32, i32) {
    %c0_i32 = arith.constant 0 : i32
    %c0_i32_0 = arith.constant 0 : i32
    return %arg0, %c0_i32 : i32, i32
  }
  func.func @transform_4(%arg0: i32, %arg1: i32) -> (i32, i32, i32) {
    %c0_i32 = arith.constant 0 : i32
    %c0_i32_0 = arith.constant 0 : i32
    %c0_i32_1 = arith.constant 0 : i32
    return %c0_i32, %arg0, %c0_i32_0 : i32, i32, i32
  }
  func.func @transform_5(%arg0: i32, %arg1: i32) -> (i32, i32, i32) {
    %c0_i32 = arith.constant 0 : i32
    %c0_i32_0 = arith.constant 0 : i32
    %c0_i32_1 = arith.constant 0 : i32
    return %c0_i32, %arg0, %c0_i32_0 : i32, i32, i32
  }
  func.func @transform_6(%arg0: i32, %arg1: i32) -> (i32, i32) {
    %c0_i32 = arith.constant 0 : i32
    return %arg0, %arg1 : i32, i32
  }
}

</mosaic_0001>

<bundles_post_ra>
// kernel: tpu_custom_call.1
= control target key start
LH: loop header
LB: loop body
LE: loop exit
PB: predicated region body
PF: predicated region fallthrough
CT: control target
= control target key end

     0   :  { %s1529_s0 = inlined_call_operand.vmem [shape: f32[2,16,8], index: 0, kind: input, shape index: {}]   ;;  %s1530_s1 = inlined_call_operand.vmem [shape: f32[2,16,8], index: 1, kind: input, shape index: {}]   ;;  %s1531_s2 = inlined_call_operand.vmem [shape: f32[16,8], index: 2, kind: input, shape index: {}]   ;;  %s1532_s3 = inlined_call_operand.vmem [shape: f32[16,8], index: 3, kind: input, shape index: {}]   ;;  %s1533_s4 = inlined_call_operand.vmem [shape: f32[8,16,128], index: 4, kind: input, shape index: {}]   ;;  %s1534_s5 = inlined_call_operand.hbm [shape: f32[8,16,128], index: 5, kind: input, shape index: {}]   ;;  %s1535_s6 = inlined_call_operand.hbm [shape: f32[16,512], index: 6, kind: output, shape index: {}]  }
   0x1   :  { %1544 = sst [smem:[#allocation18_spill]] %s1533_s4 }
   0x2   :  { %1545 = sst [smem:[#allocation19_spill]] %s1534_s5 }
   0x3   :  { %11 = vsyncpa [#allocation4], 0 }
   0x4   :  { %13 = vsyncpa [#allocation4 + $0x1], 0 }
   0x5   :  { %14 = vsyncpa [#allocation5], 0 }
   0x6   :  { %16 = vsyncpa [#allocation5 + $0x1], 0  ;;  %s1275_s21 = smov 0   ;;  %s1277_s22 = smov 0  }
   0x7   :  { %s1279_s23 = smov 0   ;;  %s1281_s24 = smov 0  }
   0x8   :  { %s1283_s25 = smov 0   ;;  %s1285_s26 = smov 0  }
   0x9   :  { %s1287_s27 = smov 0   ;;  %s1289_s28 = smov 0  }
   0xa   :  { %s1291_s29 = smov 0   ;;  %s1293_s30 = smov 0  }
   0xb   :  { %s1295_s7 = smov 0  }
   0xc LB: > { %1546 = sst [smem:[#allocation9_spill]] %s1193_s23  ;;  %s895_s8 = sadd.s32 4294967295, %s1225_s7   ;;  %s1225_s7 = sphi %s1295_s7, %s22_s7   ;;  %s1221_s30 = sphi %s1293_s30, %s1571_s30   ;;  %s1217_s29 = sphi %s1291_s29, %s1570_s29   ;;  %s1213_s28 = sphi %s1289_s28, %s1569_s28   ;;  %s1209_s27 = sphi %s1287_s27, %s1568_s27   ;;  %s1205_s26 = sphi %s1285_s26, %s1574_s26   ;;  %s1201_s25 = sphi %s1283_s25, %s1566_s25   ;;  %s1197_s24 = sphi %s1281_s24, %s1565_s24   ;;  %s1193_s23 = sphi %s1279_s23, %s1564_s23   ;;  %s1189_s22 = sphi %s1277_s22, %s1573_s22   ;;  %s1185_s21 = sphi %s1275_s21, %s1572_s21  }
   0xd   : > { %1547 = sst [smem:[#allocation10_spill]] %s1201_s25  ;;  %s896_s9 = sadd.s32 4294967294, %s1225_s7  }
   0xe   : > { %1548 = sst [smem:[#allocation11_spill]] %s1205_s26  ;;  %s31_s10 = sadd.s32 1, %s1217_s29 }
   0xf   : > { %1549 = sst [smem:[#allocation12_spill]] %s1217_s29  ;;  %s34_s11 = sadd.s32 1, %s1221_s30 }
  0x10   : > { %1550 = sst [smem:[#allocation13_spill]] %s1221_s30  ;;  %p32_p0 = scmp.ge.s32.totalorder %s31_s10, 2 }
  0x11   : > { %s149_s12 = sadd.s32 1, %s1205_s26  ;;  %p156_p1 = scmp.ne.s32.totalorder %s1205_s26, %s1201_s25 }
  0x12   : > { %p157_p2 = scmp.eq.s32.totalorder %s1225_s7, 0  ;;  %s1576_s10 = smov (%p32_p0, %s31_s10), 0 }
  0x13   : > { %1551 = sst [smem:[#allocation14_spill]] %s1576_s10  ;;  %s1578_s11 = smov (!%p32_p0, %s34_s11), %s1221_s30 }
  0x14   : > { %p1339_p3 = por %p157_p2, %p156_p1  ;;  %p188_p4 = scmp.ne.s32.totalorder %s1201_s25, %s1197_s24 }
  0x15   : > { %p36_p5 = scmp.ge.s32.totalorder %s1578_s11, 2  ;;  %p189_p6 = scmp.eq.s32.totalorder %s895_s8, 0 }
  0x16   : > { %s199_s14 = ssub.s32 %s1217_s29, %s1576_s10  ;;  %s203_s15 = sadd.s32 1, %s1193_s23 }
  0x17   : > { %s1580_s11 = smov (%p36_p5, %s1578_s11), 0  ;;  %p1349_p7 = por %p189_p6, %p188_p4 }
  0x18   : > { %1553 = sst [smem:[#allocation15_spill]] %s1580_s11  ;;  %p213_p8 = scmp.ne.s32.totalorder %s1193_s23, %s1189_s22 }
  0x19   : > { %s146_s17 = ssub.s32 %s1221_s30, %s1580_s11  ;;  %p214_p9 = scmp.eq.s32.totalorder %s895_s8, 3 }
  0x1a   : > { %p147_p10 = scmp.eq.s32.totalorder %s146_s17, 0  ;;  %s200_s18 = sor.u32 %s199_s14, %s146_s17 }
  0x1b   : > { %p201_p11 = scmp.eq.s32.totalorder %s200_s18, 0  ;;  %p1357_p12 = por %p214_p9, %p213_p8 }
  0x1c   : > { %s1362_s20 = scalar_select %p147_p10, %s1205_s26, %s149_s12  }
  0x1d   : > { %s1555_s19 = scalar_select %p1357_p12, 1, 0 }
  0x1e   : > { %1556 = sst [smem:[#allocation16_spill]] %s1362_s20  ;;  %p219_p13 = scmp.ne.s32.totalorder %s1189_s22, %s1185_s21 }
  0x1f   : > { %s1365_s24 = scalar_select %p201_p11, %s1193_s23, %s203_s15  }
  0x20   : > { %p220_p0 = scmp.eq.s32.totalorder %s896_s9, 3  ;;  %p898_p2 = scmp.ge.s32.totalorder %s1225_s7, 4 }
  0x21   : > { %1557 = sst [smem:[#allocation17_spill]] %s1365_s24 }
  0x22   : > { %p1369_p1 = por %p220_p0, %p219_p13  ;;  %236 = sbr.rel (%p898_p2) target bundleno = 86 (0x56), region = 16 }
  0x24   : > { %s1558_s10 = scalar_select %p1369_p1, 1, 0 }
  0x29   : > { %275 = sbr.rel (!%p1339_p3) target bundleno = 55 (0x37), region = 36  ;;  %s277_s8 = sand.u32 (%p1339_p3), 1, %s1205_s26  }
  0x2a   : > { %s900_s14 = sshll.u32 (%p1339_p3), %s1221_s30, 3  ;;  %s899_s12 = sshll.u32 (%p1339_p3), %s277_s8, 6 }
  0x2b   : > { %s1559_s4 = sld [smem:[#allocation18_spill]] (%p1339_p3)  ;;  %s279_s9 = scalar_lea.vmem (%p1339_p3), [#allocation2], %s899_s12 }
  0x31   : > { %s281_s18 = scalar_lea.vmem %s1559_s4, %s900_s14 }
  0x32   : > { %v323_v0 = vld [vmem:[%s281_s18] sm:$0xff]  ;;  %v325_v1 = vld [vmem:[%s281_s18 + $0x10] sm:$0xff] }
  0x33   : > { %v327_v2 = vld [vmem:[%s281_s18 + $0x20] sm:$0xff]  ;;  %324 = vst [vmem:[%s279_s9] sm:$0xff] %v323_v0  ;;  %326 = vst [vmem:[%s279_s9 + $0x8] sm:$0xff] %v325_v1  ;;  %v329_v3 = vld [vmem:[%s281_s18 + $0x30] sm:$0xff] }
  0x34   : > { %328 = vst [vmem:[%s279_s9 + $0x10] sm:$0xff] %v327_v2  ;;  %v331_v4 = vld [vmem:[%s281_s18 + $0x40] sm:$0xff]  ;;  %v333_v5 = vld [vmem:[%s281_s18 + $0x50] sm:$0xff]  ;;  %330 = vst [vmem:[%s279_s9 + $0x18] sm:$0xff] %v329_v3 }
  0x35   : > { %332 = vst [vmem:[%s279_s9 + $0x20] sm:$0xff] %v331_v4  ;;  %334 = vst [vmem:[%s279_s9 + $0x28] sm:$0xff] %v333_v5  ;;  %v335_v6 = vld [vmem:[%s281_s18 + $0x60] sm:$0xff]  ;;  %v337_v7 = vld [vmem:[%s281_s18 + $0x70] sm:$0xff] }
  0x36   : > { %336 = vst [vmem:[%s279_s9 + $0x30] sm:$0xff] %v335_v6  ;;  %338 = vst [vmem:[%s279_s9 + $0x38] sm:$0xff] %v337_v7 }
  0x37 PF: > { %s345_s8 = sand.u32 1, %s1205_s26   ;;  %s902_s14 = sshll.u32 %s1221_s30, 7 }
  0x38   : > { %s901_s12 = sshll.u32 %s345_s8, 6  ;;  %s1560_s5 = sld [smem:[#allocation19_spill]] }
  0x39   : > { %s349_s11 = scalar_lea.vmem [#allocation3], %s901_s12  ;;  %s1390_s9 = scalar_lea.sflag [#allocation4], %s345_s8 }
  0x3a   : > { %s355_s18 = sshll.u32 %s349_s11, 4  ;;  %s1388_s18 = int_to_ptr.vmem [resolvable:$true] %s355_s18 }
  0x3e   : > { %s1386_s4 = scalar_lea.hbm %s1560_s5, %s902_s14  ;;  %s1079_s14 = scalar_lea.hbm %s1560_s5, 2048 }
  0x3f   : > { %s1075_s29 = scalar_lea.hbm %s1386_s4, 1024  ;;  %p1080_p8 = scmp.lt.u32.totalorder %s1386_s4, %s1560_s5 }
  0x40   : > { %p1076_p4 = scmp.ne.s32.totalorder %s1386_s4, %s1075_s29  ;;  %p1081_p9 = scmp.lt.u32.totalorder %s1079_s14, %s1075_s29 }
  0x41   : > { %p1083_p11 = scmp.lt.u32.totalorder %s1075_s29, %s1386_s4 }
  0x42   : > { %p1077_p5 = pnand %p1076_p4, %p1339_p3  ;;  %p1082_p10 = por %p1081_p9, %p1080_p8 }
  0x44   : > { %p1078_p6 = pneg %p1077_p5  ;;  %p1084_p13 = por %p1083_p11, %p1082_p10 }
  0x46   : > { %p1085_p0 = pnand %p1084_p13, %p1078_p6 }
  0x48   : > { %1088 = shalt.err (!%p1085_p0)
}
  0x49   : > { %s1089_s11 = scalar_lea.vmem %s1388_s18, 1024  ;;  %s1227_s30 = smov [#allocation3]  }
  0x4a   : > { %p1090_p2 = scmp.ne.s32.totalorder %s1388_s18, %s1089_s11  ;;  %s1093_s20 = sshll.u32 %s1227_s30, 4  ;;  %s1094_s20 = int_to_ptr.vmem [resolvable:$false] %s1093_s20 }
  0x4b   : > { %s1095_s8 = scalar_lea.vmem %s1094_s20, 2048  ;;  %p1096_p1 = scmp.lt.s32.totalorder %s1388_s18, %s1094_s20 }
  0x4c   : > { %p1091_p4 = pnand %p1090_p2, %p1339_p3  ;;  %p1097_p12 = scmp.lt.s32.totalorder %s1095_s8, %s1089_s11 }
  0x4e   : > { %p1092_p5 = pneg %p1091_p4  ;;  %p1098_p8 = por %p1097_p12, %p1096_p1 }
  0x50   : > { %p1099_p9 = pnand %p1098_p8, %p1092_p5 }
  0x52   : > { %1102 = shalt.err (!%p1099_p9)
}
  0x53   : > { %s1228_s29 = smov 256   ;;  %s1229_s12 = smov 128  }
  0x54   : > { %s1230_s14 = smov 8  }
  0x55   : > { %947 = dma.hbm_to_vmem [thread:$0]  (%p1339_p3), %s1386_s4, 1024, %s1388_s18, %s1390_s9, %s1228_s29, %s1229_s12, %s1230_s14  }
  0x56 PF: > { %p903_p6 = scmp.ge.s32.totalorder %s1225_s7, 1  ;;  %p363_p10 = scmp.lt.s32.totalorder %s1225_s7, 5 }
  0x58   : > { %p364_p11 = pnand %p903_p6, %p363_p10 }
  0x59   : > { %s370_s17 = sand.u32 (!%p364_p11), 1, %s1201_s25  }
  0x5a   : > { %367 = sbr.rel (%p364_p11) target bundleno = 342 (0x156), region = 78  ;;  %s904_s15 = sshll.u32 (!%p364_p11), %s370_s17, 6 }
  0x5b   : > { %s1417_s11 = scalar_lea.vmem (!%p364_p11), [#allocation2], %s904_s15  ;;  %s377_s30 = scalar_lea.sflag (!%p364_p11), [#allocation4], %s370_s17 }
  0x5c   : > { %s1419_s20 = scalar_lea.vmem (!%p364_p11), [#allocation3], %s904_s15 }
  0x61   : > { %1176 = dma.done.wait (%p1349_p7), %s377_s30, 1024  }
  0x62   : > { %1178 = vsyncadd (%p1349_p7), %s377_s30, 4294966272  ;;  %p437_p3 = scmp.lt.s32.totalorder %s1209_s27, 1  ;;  %p439_p12 = scmp.lt.s32.totalorder %s1213_s28, 1  ;;  %v1231_v8 = vmov 1   ;;  %v1232_v9 = vmov 0   ;;  %v1233_v16 = vmov 2  }
  0x63   : > { %1056 = vset.pattern.permute.xlu1 %v1231_v8  ;;  %1055 = vset.pattern.permute.xlu0 %v1232_v9  ;;  %v1234_v17 = vmov 3   ;;  %v1235_v21 = vmov 4   ;;  %v1236_v23 = vmov 5   ;;  %v1237_v24 = vmov 6   ;;  %v476_v46 = vld [vmem:[%s1417_s11] sm:$0xff]  ;;  %v914_v47 = vld [vmem:[%s1419_s20 + $0x8] sm:$0xff] }
  0x64   : > { %s438_s4 = scalar_select %p437_p3, %s1209_s27, 1  ;;  %v1238_v25 = vmov 7   ;;  %v478_v48 = vld [vmem:[%s1419_s20] sm:$0xff]  ;;  %v913_v49 = vld [vmem:[%s1417_s11 + $0x8] sm:$0xff]  ;;  %v915_v50 = vld [vmem:[%s1417_s11 + $0x10] sm:$0xff] }
  0x65   : > { %s440_s13 = scalar_select %p439_p12, %s1213_s28, 1  ;;  %v916_v55 = vld [vmem:[%s1419_s20 + $0x10] sm:$0xff]  ;;  %v918_v63 = vld [vmem:[%s1419_s20 + $0x18] sm:$0xff]  ;;  %v920_v6 = vld [vmem:[%s1419_s20 + $0x20] sm:$0xff] }
  0x66   : > { %s907_s18 = sshll.u32 %s438_s4, 1  ;;  %v917_v0 = vld [vmem:[%s1417_s11 + $0x18] sm:$0xff]  ;;  %s434_s5 = sand.u32 1, %s1189_s22  }
  0x67   : > { %s442_s9 = sadd.s32 %s907_s18, %s440_s13  ;;  %s911_s29 = sshll.u32 %s440_s13, 3 }
  0x68   : > { %s908_s8 = sshll.u32 %s442_s9, 3  ;;  %s456_s25 = scalar_lea.vmem %s1531_s2, %s911_s29 }
  0x69   : > { %s444_s16 = scalar_lea.vmem %s1529_s0, %s908_s8  ;;  %s452_s30 = scalar_lea.vmem %s1530_s1, %s908_s8  ;;  %v464_v12 = vld [vmem:[%s456_s25] sm:$0xff] }
  0x6a   : > { %v462_v10 = vld [vmem:[%s444_s16] sm:$0xff]  ;;  %s460_s4 = scalar_lea.vmem %s1532_s3, %s911_s29  ;;  %s942_s23 = sshll.u32 %s1209_s27, 1 }
  0x6b   : > { %483 = vperm.xlu1 %1056, %v462_v10   ;;  %468 = vperm.xlu0 %1055, %v462_v10   ;;  %v463_v11 = vld [vmem:[%s452_s30] sm:$0xff]  ;;  %v595_v14 = vmul.f32 %v464_v12, %v462_v10  ;;  %s943_s25 = sshll.u32 %s1213_s28, 2  ;;  %s906_s26 = sshll.u32 %s434_s5, 4 }
  0x6c   : > { %v465_v13 = vld [vmem:[%s460_s4] sm:$0xff]  ;;  %v599_v20 = vmul.f32 %v464_v12, %v463_v11  ;;  %s729_s24 = sadd.s32 %s943_s25, %s942_s23  ;;  %s436_s28 = scalar_lea.vmem [#allocation6], %s906_s26 }
  0x6d   : > { %v596_v15 = vmul.f32 %v465_v13, %v463_v11  ;;  %v598_v19 = vmul.f32 %v465_v13, %v462_v10  ;;  %s944_s27 = sshll.u32 %s729_s24, 7  ;;  %s717_s9 = scalar_lea.sflag [#allocation5], %s434_s5 }
  0x6e   : > { %s1465_s18 = scalar_lea.hbm %s1535_s6, %s944_s27  ;;  %p1561_p1 = scmp.ne.s32.totalorder %s1555_s19, 0 }
  0x6f   : > { %487 = vperm.xlu1 %1056, %v463_v11   ;;  %473 = vperm.xlu0 %1055, %v463_v11   ;;  %v597_v18 = vsub.f32 %v595_v14, %v596_v15  ;;  %v600_v22 = vadd.f32 %v599_v20, %v598_v19  ;;  %s1239_s29 = smov [#allocation6]  }
  0x70   : > { %s1107_s12 = sshll.u32 %s1239_s29, 4  ;;  %s1108_s12 = int_to_ptr.vmem [resolvable:$false] %s1107_s12 }
  0x71   : > { %s1109_s14 = scalar_lea.vmem %s1108_s12, 512 }
  0x73   : > { %1057 = vset.pattern.permute.xlu1 %v1233_v16  ;;  %1059 = vset.pattern.permute.xlu0 %v1234_v17 }
  0x74   : > { %503 = vperm.xlu1 %1057, %v463_v11   ;;  %519 = vperm.xlu0 %1059, %v463_v11  }
  0x78   : > { %1058 = vset.pattern.permute.xlu1 %v1234_v17  ;;  %1062 = vset.pattern.permute.xlu0 %v1231_v8 }
  0x79   : > { %515 = vperm.xlu1 %1058, %v462_v10   ;;  %618 = vperm.xlu0 %1062, %v597_v18  }
  0x7d   : > { %1060 = vset.pattern.permute.xlu1 %v1235_v21  ;;  %1063 = vset.pattern.permute.xlu0 %v1233_v16 }
  0x7e   : > { %531 = vperm.xlu1 %1060, %v462_v10   ;;  %499 = vperm.xlu0 %1063, %v462_v10  }
  0x82   : > { %535 = vperm.xlu1 %1060, %v463_v11   ;;  %636 = vperm.xlu0 %1063, %v600_v22  }
  0x86   : > { %1061 = vset.pattern.permute.xlu1 %v1232_v9  ;;  %1067 = vset.pattern.permute.xlu0 %v1235_v21 }
  0x87   : > { %603 = vperm.xlu1 %1061, %v597_v18   ;;  %660 = vperm.xlu0 %1067, %v597_v18  }
  0x8b   : > { %608 = vperm.xlu1 %1061, %v600_v22   ;;  %1068 = vset.pattern.permute.xlu0 %v1236_v23 }
  0x8c   : > { %547 = vperm.xlu0 %1068, %v462_v10  }
  0x8f   : > { %1064 = vset.pattern.permute.xlu1 %v1231_v8 }
  0x90   : > { %622 = vperm.xlu1 %1064, %v600_v22   ;;  %674 = vperm.xlu0 %1068, %v597_v18  }
  0x94   : > { %1065 = vset.pattern.permute.xlu1 %v1233_v16  ;;  %1072 = vset.pattern.permute.xlu0 %v1237_v24  ;;  %v921_v16 = vld [vmem:[%s1417_s11 + $0x28] sm:$0xff] }
  0x95   : > { %632 = vperm.xlu1 %1065, %v597_v18   ;;  %567 = vperm.xlu0 %1072, %v463_v11  }
  0x99   : > { %1066 = vset.pattern.permute.xlu1 %v1234_v17  ;;  %1073 = vset.pattern.permute.xlu0 %v1238_v25  ;;  %v922_v17 = vld [vmem:[%s1419_s20 + $0x28] sm:$0xff] }
  0x9a   : > { %646 = vperm.xlu1 %1066, %v597_v18   ;;  %579 = vperm.xlu0 %1073, %v462_v10  }
  0x9e   : > { %650 = vperm.xlu1 %1066, %v600_v22   ;;  %706 = vperm.xlu0 %1073, %v600_v22  }
  0xa2   : > { %1069 = vset.pattern.permute.xlu1 %v1235_v21 }
  0xa3   : > { %664 = vperm.xlu1 %1069, %v600_v22  }
  0xa7   : > { %1070 = vset.pattern.permute.xlu1 %v1236_v23 }
  0xa8   : > { %551 = vperm.xlu1 %1070, %v463_v11  }
  0xac   : > { %678 = vperm.xlu1 %1070, %v600_v22  }
  0xb0   : > { %1071 = vset.pattern.permute.xlu1 %v1237_v24  ;;  %v924_v24 = vld [vmem:[%s1419_s20 + $0x30] sm:$0xff] }
  0xb1   : > { %563 = vperm.xlu1 %1071, %v462_v10   ;;  %v919_v10 = vld [vmem:[%s1417_s11 + $0x20] sm:$0xff] }
  0xb5   : > { %688 = vperm.xlu1 %1071, %v597_v18  }
  0xb9   : > { %692 = vperm.xlu1 %1071, %v600_v22  }
  0xbd   : > { %1074 = vset.pattern.permute.xlu1 %v1238_v25 }
  0xbe   : > { %583 = vperm.xlu1 %1074, %v463_v11  }
  0xc2   : > { %702 = vperm.xlu1 %1074, %v597_v18  }
  0xea   : > { %v484_v26 = vpop.permute.xlu1 %483  ;;  %v469_v32 = vpop.permute.xlu0 %468 }
  0xeb   : > { %v477_v52 = vmul.f32 %v476_v46, %v469_v32  ;;  %v492_v57 = vmul.f32 %v913_v49, %v484_v26  ;;  %v923_v26 = vld [vmem:[%s1417_s11 + $0x30] sm:$0xff] }
  0xee   : > { %v488_v27 = vpop.permute.xlu1 %487  ;;  %v474_v35 = vpop.permute.xlu0 %473 }
  0xef   : > { %v495_v53 = vmul.f32 %v914_v47, %v488_v27  ;;  %v479_v54 = vmul.f32 %v478_v48, %v474_v35 }
  0xf1   : > { %v496_v60 = vsub.f32 %v492_v57, %v495_v53  ;;  %v480_v61 = vsub.f32 %v477_v52, %v479_v54 }
  0xf3   : > { %v504_v28 = vpop.permute.xlu1 %503  ;;  %v520_v36 = vpop.permute.xlu0 %519  ;;  %v497_v3 = vadd.f32 %v496_v60, %v480_v61 }
  0xf4   : > { %v511_v62 = vmul.f32 %v916_v55, %v504_v28  ;;  %v527_v4 = vmul.f32 %v918_v63, %v520_v36 }
  0xf8   : > { %v516_v29 = vpop.permute.xlu1 %515  ;;  %v619_v39 = vpop.permute.xlu0 %618 }
  0xf9   : > { %v524_v5 = vmul.f32 %v917_v0, %v516_v29  ;;  %v626_v8 = vmul.f32 %v913_v49, %v619_v39 }
  0xfb   : > { %v528_v18 = vsub.f32 %v524_v5, %v527_v4 }
  0xfd   : > { %v532_v30 = vpop.permute.xlu1 %531  ;;  %v500_v41 = vpop.permute.xlu0 %499 }
  0xfe   : > { %v508_v58 = vmul.f32 %v915_v50, %v500_v41  ;;  %v540_v20 = vmul.f32 %v919_v10, %v532_v30 }
 0x100   : > { %v512_v1 = vsub.f32 %v508_v58, %v511_v62 }
 0x101   : > { %v536_v31 = vpop.permute.xlu1 %535  ;;  %v637_v43 = vpop.permute.xlu0 %636 }
 0x102   : > { %v513_v11 = vadd.f32 %v512_v1, %v497_v3  ;;  %v543_v12 = vmul.f32 %v920_v6, %v536_v31  ;;  %v642_v14 = vmul.f32 %v916_v55, %v637_v43 }
 0x104   : > { %v529_v27 = vadd.f32 %v528_v18, %v513_v11  ;;  %v544_v32 = vsub.f32 %v540_v20, %v543_v12 }
 0x106   : > { %v604_v33 = vpop.permute.xlu1 %603  ;;  %v661_v45 = vpop.permute.xlu0 %660  ;;  %v545_v49 = vadd.f32 %v544_v32, %v529_v27 }
 0x107   : > { %v612_v21 = vmul.f32 %v604_v33, %v476_v46  ;;  %v668_v36 = vmul.f32 %v919_v10, %v661_v45 }
 0x10a   : > { %v609_v34 = vpop.permute.xlu1 %608 }
 0x10b   : > { %v548_v56 = vpop.permute.xlu0 %547  ;;  %v614_v13 = vmul.f32 %v609_v34, %v478_v48 }
 0x10c   : > { %v556_v28 = vmul.f32 %v921_v16, %v548_v56 }
 0x10d   : > { %v615_v31 = vsub.f32 %v612_v21, %v614_v13 }
 0x10f   : > { %v623_v37 = vpop.permute.xlu1 %622  ;;  %v675_v2 = vpop.permute.xlu0 %674 }
 0x110   : > { %v628_v9 = vmul.f32 %v914_v47, %v623_v37  ;;  %v682_v47 = vmul.f32 %v921_v16, %v675_v2 }
 0x112   : > { %v629_v22 = vsub.f32 %v626_v8, %v628_v9 }
 0x114   : > { %v633_v38 = vpop.permute.xlu1 %632  ;;  %v568_v25 = vpop.permute.xlu0 %567  ;;  %v630_v39 = vadd.f32 %v629_v22, %v615_v31 }
 0x115   : > { %v640_v15 = vmul.f32 %v915_v50, %v633_v38  ;;  %v575_v38 = vmul.f32 %v924_v24, %v568_v25 }
 0x117   : > { %v643_v34 = vsub.f32 %v640_v15, %v642_v14 }
 0x119   : > { %v647_v40 = vpop.permute.xlu1 %646  ;;  %v580_v43 = vpop.permute.xlu0 %579  ;;  %v644_v50 = vadd.f32 %v643_v34, %v630_v39 }
 0x11a   : > { %v654_v35 = vmul.f32 %v917_v0, %v647_v40 }
 0x11d   : > { %v651_v42 = vpop.permute.xlu1 %650 }
 0x11e   : > { %v656_v23 = vmul.f32 %v918_v63, %v651_v42  ;;  %v925_v42 = vld [vmem:[%s1417_s11 + $0x38] sm:$0xff]  ;;  %s733_s11 = sshll.u32 %s436_s28, 4  ;;  %s1467_s11 = int_to_ptr.vmem [resolvable:$true] %s733_s11 }
 0x11f   : > { %v588_v52 = vmul.f32 %v925_v42, %v580_v43  ;;  %s1103_s8 = scalar_lea.vmem %s1467_s11, 256  ;;  %p1110_p2 = scmp.lt.s32.totalorder %s1467_s11, %s1108_s12 }
 0x120   : > { %v657_v41 = vsub.f32 %v654_v35, %v656_v23  ;;  %p1104_p7 = scmp.ne.s32.totalorder %s1467_s11, %s1103_s8  ;;  %p1111_p4 = scmp.lt.s32.totalorder %s1109_s14, %s1103_s8 }
 0x122   : > { %v665_v44 = vpop.permute.xlu1 %664  ;;  %v658_v53 = vadd.f32 %v657_v41, %v644_v50  ;;  %p1105_p13 = pnand %p1104_p7, %p1561_p1  ;;  %p1112_p5 = por %p1111_p4, %p1110_p2 }
 0x123   : > { %v670_v37 = vmul.f32 %v920_v6, %v665_v44 }
 0x124   : > { %p1106_p0 = pneg %p1105_p13 }
 0x125   : > { %v671_v40 = vsub.f32 %v668_v36, %v670_v37 }
 0x126   : > { %p1113_p8 = pnand %p1112_p5, %p1106_p0 }
 0x127   : > { %v552_v51 = vpop.permute.xlu1 %551  ;;  %v672_v60 = vadd.f32 %v671_v40, %v658_v53 }
 0x128   : > { %v559_v29 = vmul.f32 %v922_v17, %v552_v51  ;;  %v940_v51 = vld [vmem:[%s1419_s20 + $0x38] sm:$0xff] }
 0x12a   : > { %v560_v46 = vsub.f32 %v556_v28, %v559_v29 }
 0x12b   : > { %v679_v59 = vpop.permute.xlu1 %678 }
 0x12c   : > { %v684_v48 = vmul.f32 %v922_v17, %v679_v59  ;;  %v561_v55 = vadd.f32 %v560_v46, %v545_v49  ;;  %v707_v59 = vpop.permute.xlu0 %706 }
 0x12d   : > { %v712_v2 = vmul.f32 %v940_v51, %v707_v59 }
 0x12e   : > { %v685_v56 = vsub.f32 %v682_v47, %v684_v48 }
 0x130   : > { %v564_v7 = vpop.permute.xlu1 %563  ;;  %v686_v1 = vadd.f32 %v685_v56, %v672_v60 }
 0x131   : > { %v572_v30 = vmul.f32 %v923_v26, %v564_v7 }
 0x133   : > { %v576_v45 = vsub.f32 %v572_v30, %v575_v38 }
 0x134   : > { %v689_v19 = vpop.permute.xlu1 %688 }
 0x135   : > { %v696_v57 = vmul.f32 %v923_v26, %v689_v19  ;;  %v577_v61 = vadd.f32 %v576_v45, %v561_v55 }
 0x138   : > { %v693_v33 = vpop.permute.xlu1 %692 }
 0x139   : > { %v698_v44 = vmul.f32 %v924_v24, %v693_v33 }
 0x13b   : > { %v699_v62 = vsub.f32 %v696_v57, %v698_v44 }
 0x13d   : > { %v584_v54 = vpop.permute.xlu1 %583  ;;  %v700_v5 = vadd.f32 %v699_v62, %v686_v1 }
 0x13e   : > { %v591_v58 = vmul.f32 %v940_v51, %v584_v54 }
 0x140   : > { %v592_v63 = vsub.f32 %v588_v52, %v591_v58 }
 0x141   : > { %v703_v0 = vpop.permute.xlu1 %702 }
 0x142   : > { %v593_v3 = vadd.f32 %v592_v63, %v577_v61  ;;  %v710_v4 = vmul.f32 %v925_v42, %v703_v0 }
 0x144   : > { %v713_v6 = vsub.f32 %v710_v4, %v712_v2  ;;  %594 = vst [vmem:[%s436_s28] sm:$0xff] %v593_v3 }
 0x146   : > { %v714_v7 = vadd.f32 %v713_v6, %v700_v5 }
 0x148   : > { %715 = vst [vmem:[%s436_s28 + $0x8] sm:$0xff] %v714_v7 }
 0x149   : > { %1116 = shalt.err (!%p1113_p8)
}
 0x14a   : > { %s1117_s16 = scalar_lea.hbm %s1465_s18, 256  ;;  %s1121_s30 = scalar_lea.hbm %s1535_s6, 1024 }
 0x14b   : > { %p1118_p9 = scmp.ne.s32.totalorder %s1465_s18, %s1117_s16  ;;  %p1122_p11 = scmp.lt.u32.totalorder %s1465_s18, %s1535_s6 }
 0x14c   : > { %p1123_p3 = scmp.lt.u32.totalorder %s1121_s30, %s1117_s16  ;;  %p1125_p7 = scmp.lt.u32.totalorder %s1117_s16, %s1465_s18 }
 0x14d   : > { %p1119_p6 = pnand %p1118_p9, %p1561_p1 }
 0x14e   : > { %p1124_p12 = por %p1123_p3, %p1122_p11 }
 0x14f   : > { %p1120_p10 = pneg %p1119_p6 }
 0x150   : > { %p1126_p13 = por %p1125_p7, %p1124_p12 }
 0x152   : > { %p1127_p0 = pnand %p1126_p13, %p1120_p10 }
 0x154   : > { %1130 = shalt.err (!%p1127_p0)
}
 0x155   : > { %949 = dma.vmem_to_hbm [thread:$0]  (%p1561_p1), %s1467_s11, 256, %s1465_s18, %s717_s9  }
 0x156 PF: > { %p955_p2 = scmp.ge.s32.totalorder %s1225_s7, 2  ;;  %s745_s23 = sand.u32 1, %s1185_s21  }
 0x157   : > { %p1562_p4 = scmp.ne.s32.totalorder %s1558_s10, 0  ;;  %s746_s25 = scalar_lea.sflag [#allocation5], %s745_s23 }
 0x159   : > { %p952_p5 = pnand %p955_p2, %p1562_p4 }
 0x15b   : > { %1180 = dma.done.wait (!%p952_p5), %s746_s25, 256  }
 0x15c   : > { %1182 = vsyncadd (!%p952_p5), %s746_s25, 4294967040  ;;  %s22_s7 = sadd.s32 1, %s1225_s7   ;;  %s1563_s26 = sld [smem:[#allocation9_spill]] }
 0x15d   : > { %p19_p8 = scmp.ge.s32.totalorder %s22_s7, 6   ;;  %s1564_s23 = sld [smem:[#allocation17_spill]] }
 0x15e   : > { %s1565_s24 = sld [smem:[#allocation10_spill]]  ;;  %s1566_s25 = sld [smem:[#allocation11_spill]] }
 0x15f   : > { %s1567_s19 = sld [smem:[#allocation16_spill]]  ;;  %s1568_s27 = sld [smem:[#allocation12_spill]] }
 0x160   : > { %s1569_s28 = sld [smem:[#allocation13_spill]]  ;;  %s1570_s29 = sld [smem:[#allocation14_spill]] }
 0x161   : > { %s1571_s30 = sld [smem:[#allocation15_spill]]  ;;  %s1572_s21 = smov %s1189_s22 }
 0x162   : > { %s1573_s22 = smov %s1563_s26  ;;  %21 = sbr.rel (!%p19_p8) target bundleno = 12 (0xc), region = 161 }
 0x165   : > { %s1574_s26 = smov %s1567_s19 }
 0x169   :  { %751 = vsyncpa [#allocation4], 1 }
 0x16a   :  { %753 = vsyncpa [#allocation4 + $0x1], 1 }
 0x16b   :  { %754 = vsyncpa [#allocation5], 1 }
 0x16c   :  { %756 = vsyncpa [#allocation5 + $0x1], 1 }

</bundles_post_ra>
